<compile_context>
chip_gen: v6e
topology: v6e:2x2x1
jax: 0.10.0
libtpu: 0.0.40
codegen_flags: <defaults>
</compile_context>

<pallas_src>
import functools

import jax
import jax.numpy as jnp
from jax.experimental import pallas as pl
from jax.experimental.pallas import tpu as pltpu


def _round_up(x, m):
    return ((x + m - 1) // m) * m


def _vmem_budget_bytes():
    """Per-generation VMEM budget: ~3/4 of physical, capped at 96 MiB."""
    try:
        cap = int(pltpu.get_tpu_info().vmem_capacity_bytes)
    except Exception:  # no TPU info available -> conservative (v7x-safe)
        cap = 64 * 1024 * 1024
    return min(cap * 3 // 4, 96 * 1024 * 1024)


_VMEM_LIMIT = _vmem_budget_bytes()

_TILE_CANDIDATES = (4096, 2048, 1024, 512, 256, 128)


def _largest_divisor_tile(n, cap):
    """Largest candidate tile <= cap that divides n (n is a multiple of 128)."""
    for t in _TILE_CANDIDATES:
        if t <= cap and n % t == 0:
            return t
    return n  # only reachable for n < 128, which padding prevents


def _pick_agg_tiles(n_pad, hidden, out_size, budget):
    """Tile sizes for the (row, reduction) grid over the N x N adjacency."""
    # Large reduction tile to amortize the ~0.35us per-grid-step overhead
    # (matters most on v7x where a 512-tile DMA is cheaper than the overhead).
    tk = _largest_divisor_tile(n_pad, 4096)
    # Keep >= 2 row blocks where possible so the "parallel" axis shards across
    # both v7x TensorCores; still big enough to amortize overhead elsewhere.
    tm_cap = 1024 if n_pad >= 2048 else max(128, n_pad // 2)
    tm = _largest_divisor_tile(n_pad, max(128, tm_cap))

    def fits(tm_, tk_):
        a_bytes = 2 * tm_ * tk_ * 1                         # int8 A, 2 buffers
        rhs_bytes = 2 * n_pad * max(hidden, out_size) * 4   # resident RHS slab
        acc_bytes = tm_ * max(hidden, out_size) * 4
        out_bytes = 2 * tm_ * out_size * 4
        misc = 2 * tm_ * 4 + hidden * out_size * 4 + (hidden + out_size) * 4
        return a_bytes + rhs_bytes + acc_bytes + out_bytes + misc < budget

    while not fits(tm, tk) and tk > 128:
        tk = _largest_divisor_tile(n_pad, tk // 2)
    while not fits(tm, tk) and tm > 128:
        tm = _largest_divisor_tile(n_pad, tm // 2)
    return tm, tk


# -----------------------------------------------------------------------------
# Kernels
# -----------------------------------------------------------------------------
def _feature_transform_kernel(x_ref, w_ref, d_ref, o_ref):
    # XWs = D^{-1/2} (X @ W1): column-side normalization folded in here so the
    # adjacency loop never touches it.
    xw = jnp.dot(x_ref[...], w_ref[...], preferred_element_type=jnp.float32)
    o_ref[...] = (d_ref[...] * xw).astype(o_ref.dtype)


def _gcn_layer0_kernel(a_ref, d_ref, xws_ref, b1_ref, w2_ref, o_ref, acc_ref,
                       *, tk):
    """Layer 0: z2s_tile = D^{-1/2} relu(D^{-1/2} A (D^{-1/2} X W1) + b1) W2."""
    k = pl.program_id(1)

    @pl.when(k == 0)
    def _():
        acc_ref[...] = jnp.zeros_like(acc_ref)

    # int8 0/1 adjacency -> f32 (exact).  No per-element normalization: it was
    # hoisted onto the RHS rows and the epilogue row scale.
    a = a_ref[...].astype(jnp.float32)
    off = pl.multiple_of(k * tk, tk)
    acc_ref[...] += jnp.dot(a, xws_ref[pl.ds(off, tk), :],
                            preferred_element_type=jnp.float32)

    @pl.when(k == pl.num_programs(1) - 1)
    def _():
        d = d_ref[...]                                   # (tm, 1) = D^{-1/2} rows
        h = jnp.maximum(d * acc_ref[...] + b1_ref[...], 0.0)
        # TODO(synk): training-mode nn.Dropout(p) would mask `h` here (before
        # the fused W2 matmul); eval-mode dropout is the identity.
        # Fold layer 1's column normalization (d * h) into the fused W2.
        o_ref[...] = jnp.dot(d * h, w2_ref[...],
                             preferred_element_type=jnp.float32).astype(o_ref.dtype)


def _gcn_layer1_kernel(a_ref, d_ref, z_ref, b2_ref, o_ref, acc_ref, *, tk):
    """Layer 1: out_tile = D^{-1/2} A Z2s + b2   (no activation)."""
    k = pl.program_id(1)

    @pl.when(k == 0)
    def _():
        acc_ref[...] = jnp.zeros_like(acc_ref)

    a = a_ref[...].astype(jnp.float32)
    off = pl.multiple_of(k * tk, tk)
    acc_ref[...] += jnp.dot(a, z_ref[pl.ds(off, tk), :],
                            preferred_element_type=jnp.float32)

    @pl.when(k == pl.num_programs(1) - 1)
    def _():
        o_ref[...] = (d_ref[...] * acc_ref[...] + b2_ref[...]).astype(o_ref.dtype)


# -----------------------------------------------------------------------------
# pallas_call wrappers
# -----------------------------------------------------------------------------
def feature_transform(x, w, d):
    n, f_in = x.shape
    f_out = w.shape[1]
    tm = _largest_divisor_tile(n, 1024)
    return pl.pallas_call(
        _feature_transform_kernel,
        out_shape=jax.ShapeDtypeStruct((n, f_out), jnp.float32),
        grid=(n // tm,),
        in_specs=[
            pl.BlockSpec((tm, f_in), lambda i: (i, 0)),
            pl.BlockSpec((f_in, f_out), lambda i: (0, 0)),
            pl.BlockSpec((tm, 1), lambda i: (i, 0)),
        ],
        out_specs=pl.BlockSpec((tm, f_out), lambda i: (i, 0)),
        compiler_params=pltpu.CompilerParams(
            dimension_semantics=("parallel",),
            vmem_limit_bytes=_VMEM_LIMIT,
        ),
    )(x, w, d)


def gcn_layer0(a_i8, d, xws, b1, w2):
    n = a_i8.shape[0]
    hidden = xws.shape[1]
    out_size = w2.shape[1]
    tm, tk = _pick_agg_tiles(n, hidden, out_size, _VMEM_LIMIT)
    kernel = functools.partial(_gcn_layer0_kernel, tk=tk)
    return pl.pallas_call(
        kernel,
        out_shape=jax.ShapeDtypeStruct((n, out_size), jnp.float32),
        grid=(n // tm, n // tk),
        in_specs=[
            pl.BlockSpec((tm, tk), lambda i, k: (i, k)),            # int8 A tile
            pl.BlockSpec((tm, 1), lambda i, k: (i, 0)),             # D^{-1/2} rows
            pl.BlockSpec((n, hidden), lambda i, k: (0, 0)),         # resident D^{-1/2} X W1
            pl.BlockSpec((1, hidden), lambda i, k: (0, 0)),         # b1
            pl.BlockSpec((hidden, out_size), lambda i, k: (0, 0)),  # W2 (resident)
        ],
        out_specs=pl.BlockSpec((tm, out_size), lambda i, k: (i, 0)),
        scratch_shapes=[pltpu.VMEM((tm, hidden), jnp.float32)],
        compiler_params=pltpu.CompilerParams(
            dimension_semantics=("parallel", "arbitrary"),
            vmem_limit_bytes=_VMEM_LIMIT,
        ),
    )(a_i8, d, xws, b1, w2)


def gcn_layer1(a_i8, d, z2s, b2):
    n = a_i8.shape[0]
    out_size = z2s.shape[1]
    tm, tk = _pick_agg_tiles(n, out_size, out_size, _VMEM_LIMIT)
    kernel = functools.partial(_gcn_layer1_kernel, tk=tk)
    return pl.pallas_call(
        kernel,
        out_shape=jax.ShapeDtypeStruct((n, out_size), jnp.float32),
        grid=(n // tm, n // tk),
        in_specs=[
            pl.BlockSpec((tm, tk), lambda i, k: (i, k)),            # int8 A tile
            pl.BlockSpec((tm, 1), lambda i, k: (i, 0)),             # D^{-1/2} rows
            pl.BlockSpec((n, out_size), lambda i, k: (0, 0)),       # resident D^{-1/2} H1 W2
            pl.BlockSpec((1, out_size), lambda i, k: (0, 0)),       # b2
        ],
        out_specs=pl.BlockSpec((tm, out_size), lambda i, k: (i, 0)),
        scratch_shapes=[pltpu.VMEM((tm, out_size), jnp.float32)],
        compiler_params=pltpu.CompilerParams(
            dimension_semantics=("parallel", "arbitrary"),
            vmem_limit_bytes=_VMEM_LIMIT,
        ),
    )(a_i8, d, z2s, b2)


# -----------------------------------------------------------------------------
# Model
# -----------------------------------------------------------------------------
def _glorot_uniform(key, shape):
    fan_in, fan_out = shape
    limit = jnp.sqrt(6.0 / (fan_in + fan_out))
    return jax.random.uniform(key, shape, jnp.float32, -limit, limit)


class GCNLayerPallas:
    """Mirror of the PyTorch GCNLayer (hidden_size=16, ReLU after layer 0)."""

    def __init__(self, in_size, out_size, dropout, key):
        hidden_size = 16
        k1, k2 = jax.random.split(key)
        # DGL GraphConv: xavier_uniform weights, zero bias.
        self.w1 = _glorot_uniform(k1, (in_size, hidden_size))
        self.b1 = jnp.zeros((1, hidden_size), jnp.float32)
        self.w2 = _glorot_uniform(k2, (hidden_size, out_size))
        self.b2 = jnp.zeros((1, out_size), jnp.float32)
        self.dropout = dropout

    def __call__(self, adj, features):
        n = adj.shape[0]
        n_pad = _round_up(max(n, 128), 128)  # padding with zero rows/cols is exact

        # Degrees from row sums: matches DGL norm='both' for a symmetric 0/1
        # adjacency; clamped to >= 1 like DGL's allow_zero_in_degree handling.
        deg = jnp.clip(jnp.sum(adj, axis=1), 1.0, None)
        d_inv_sqrt = jax.lax.rsqrt(deg).astype(jnp.float32)

        # int8 storage is exact only for an unweighted 0/1 adjacency (weighted
        # graphs would need a different path).  Padded rows/cols are zero.
        a_i8 = jnp.pad(adj, ((0, n_pad - n), (0, n_pad - n))).astype(jnp.int8)
        x_p = jnp.pad(features.astype(jnp.float32), ((0, n_pad - n), (0, 0)))
        d_p = jnp.pad(d_inv_sqrt, (0, n_pad - n),
                      constant_values=1.0).reshape(n_pad, 1)

        # Column-normalized feature transform, hoisted out of the A loop.
        xws = feature_transform(x_p, self.w1, d_p)          # D^{-1/2} X W1
        # Layer 0 aggregation + row-scale + bias + ReLU, with layer 1's
        # normalization and W2 fused into the epilogue (eval-mode dropout is
        # the identity between layers).
        z2s = gcn_layer0(a_i8, d_p, xws, self.b1, self.w2)  # D^{-1/2} H1 W2
        # Layer 1 aggregation + row-scale + bias (no activation).
        out = gcn_layer1(a_i8, d_p, z2s, self.b2)
        return out[:n]


# -----------------------------------------------------------------------------
# Demo / self-check
# -----------------------------------------------------------------------------
if __name__ == "__main__":
    key = jax.random.PRNGKey(0)
    k_adj, k_feat, k_params = jax.random.split(key, 3)

    num_nodes, in_size, out_size = 8, 16, 4

    # Deterministic small undirected graph: symmetric 0/1 adjacency, no self loops.
    upper = (jax.random.uniform(k_adj, (num_nodes, num_nodes)) > 0.5).astype(jnp.float32)
    adj = jnp.triu(upper, k=1)
    adj = adj + adj.T

    features = jax.random.normal(k_feat, (num_nodes, in_size), jnp.float32)

    model = GCNLayerPallas(in_size, out_size, dropout=0.5, key=k_params)
    out = model(adj, features)
    out = jax.block_until_ready(out)

    # Pure-JAX reference (eval mode): relu(Â X W1 + b1) -> Â (. W2) + b2
    deg = jnp.clip(jnp.sum(adj, axis=1), 1.0, None)
    dis = jax.lax.rsqrt(deg)
    a_hat = adj * dis[:, None] * dis[None, :]
    h_ref = jnp.maximum(a_hat @ (features @ model.w1) + model.b1, 0.0)
    out_ref = a_hat @ (h_ref @ model.w2) + model.b2

    assert out.shape == (num_nodes, out_size)
    assert out.dtype == jnp.float32
    assert jnp.allclose(out, out_ref, rtol=1e-3, atol=1e-3), (
        f"max abs err {jnp.max(jnp.abs(out - out_ref))}")
    print("KERNEL_OK")
</pallas_src>

<mosaic_0001>
module attributes {stable_mosaic.version = 11 : i64} {
  func.func @_feature_transform_kernel(%arg0: i32, %arg1: memref<128x16xf32, #tpu.memory_space<vmem>>, %arg2: memref<16x16xf32, #tpu.memory_space<vmem>>, %arg3: memref<128x1xf32, #tpu.memory_space<vmem>>, %arg4: memref<128x16xf32, #tpu.memory_space<vmem>>) attributes {dimension_semantics = [#tpu.dimension_semantics<parallel>], iteration_bounds = array<i64: 1>, scalar_prefetch = 0 : i64, scratch_operands = 0 : i64, tpu.core_type = #tpu.core_type<tc>, window_params = [{transform_indices = @transform_0, window_bounds = array<i64: 128, 16>}, {pipeline_mode = #tpu.pipeline_mode<synchronous>, transform_indices = @transform_1, window_bounds = array<i64: 16, 16>}, {transform_indices = @transform_2, window_bounds = array<i64: 128, 1>}, {transform_indices = @transform_3, window_bounds = array<i64: 128, 16>}]} {
    %c0 = arith.constant 0 : index
    %c0_0 = arith.constant 0 : index
    %0 = vector.load %arg1[%c0, %c0_0] : memref<128x16xf32, #tpu.memory_space<vmem>>, vector<128x16xf32>
    %c0_1 = arith.constant 0 : index
    %c0_2 = arith.constant 0 : index
    %1 = vector.load %arg2[%c0_1, %c0_2] : memref<16x16xf32, #tpu.memory_space<vmem>>, vector<16x16xf32>
    %cst = arith.constant dense<0.000000e+00> : vector<128x16xf32>
    %2 = tpu.matmul %0, %1, %cst {dimension_numbers = #tpu.dot_dimension_numbers<[1], [0], [0], [1], [0, 0, 1, 1], [], []>} : vector<128x16xf32>, vector<16x16xf32>, vector<128x16xf32> -> vector<128x16xf32>
    %c0_3 = arith.constant 0 : index
    %c0_4 = arith.constant 0 : index
    %3 = vector.load %arg3[%c0_3, %c0_4] : memref<128x1xf32, #tpu.memory_space<vmem>>, vector<128x1xf32>
    %4 = vector.broadcast %3 : vector<128x1xf32> to vector<128x16xf32>
    %5 = arith.mulf %4, %2 : vector<128x16xf32>
    %c0_5 = arith.constant 0 : index
    %c0_6 = arith.constant 0 : index
    %6 = vector.load %arg4[%c0_5, %c0_6] : memref<128x16xf32, #tpu.memory_space<vmem>>, vector<128x16xf32>
    tpu.vector_store %arg4[%c0_5, %c0_6], %5 {strides = array<i32>} : memref<128x16xf32, #tpu.memory_space<vmem>>, vector<128x16xf32>,
    return
  }
  func.func @transform_0(%arg0: i32) -> (i32, i32) {
    %c0_i32 = arith.constant 0 : i32
    %c0_i32_0 = arith.constant 0 : i32
    return %arg0, %c0_i32 : i32, i32
  }
  func.func @transform_1(%arg0: i32) -> (i32, i32) {
    %c0_i32 = arith.constant 0 : i32
    %c0_i32_0 = arith.constant 0 : i32
    %c0_i32_1 = arith.constant 0 : i32
    return %c0_i32, %c0_i32_0 : i32, i32
  }
  func.func @transform_2(%arg0: i32) -> (i32, i32) {
    %c0_i32 = arith.constant 0 : i32
    %c0_i32_0 = arith.constant 0 : i32
    return %arg0, %c0_i32 : i32, i32
  }
  func.func @transform_3(%arg0: i32) -> (i32, i32) {
    %c0_i32 = arith.constant 0 : i32
    %c0_i32_0 = arith.constant 0 : i32
    return %arg0, %c0_i32 : i32, i32
  }
}

</mosaic_0001>

<bundles_post_ra>
// kernel: tpu_custom_call.1
= control target key start
LH: loop header
LB: loop body
LE: loop exit
PB: predicated region body
PF: predicated region fallthrough
CT: control target
= control target key end

     0   :  { %v427_v2 = vmov 0   ;;  %vm32_vm0 = vcmask 130048   ;;  %s630_s1 = inlined_call_operand.vmem [shape: f32[16,16], index: 1, kind: input, shape index: {}]   ;;  %s631_s0 = inlined_call_operand.vmem [shape: f32[128,16], index: 0, kind: input, shape index: {}]   ;;  %s632_s2 = inlined_call_operand.vmem [shape: f32[128,1], index: 2, kind: input, shape index: {}]   ;;  %s633_s3 = inlined_call_operand.vmem [shape: f32[128,16], index: 3, kind: output, shape index: {}]  }
   0x1   :  { %v31_v0 = vld [vmem:[%s630_s1 + $0x8] sm:$0xff]  ;;  %v30_v1 = vld [vmem:[%s630_s1] sm:$0xff]  ;;  %426 = vset.pattern.permute.xlu1 %v427_v2  ;;  %425 = vset.pattern.permute.xlu0 %v427_v2  ;;  %v16_v7 = vld [vmem:[%s631_s0 + $0x10] sm:$0xff] }
   0x2   :  { %392 = vmatprep.subr.mxu0 %v31_v0  ;;  %420 = vmatprep.subr.mxu1 %v31_v0  ;;  %v14_v3 = vld [vmem:[%s631_s0] sm:$0xff]  ;;  %v15_v5 = vld [vmem:[%s631_s0 + $0x8] sm:$0xff]  ;;  %v24_v8 = vld [vmem:[%s631_s0 + $0x50] sm:$0xff] }
   0x3   :  { %393 = vmatpush3.msra.mxu0 %v31_v0  ;;  %422 = vmatpush3.msra.mxu1 %v31_v0  ;;  %v22_v4 = vld [vmem:[%s631_s0 + $0x40] sm:$0xff]  ;;  %v23_v6 = vld [vmem:[%s631_s0 + $0x48] sm:$0xff]  ;;  %v228_v9 = vld [vmem:[%s632_s2 + $0x10] sm:$0xff] }
   0x4   :  { %394 = vmatprep.subr.mxu0 %v30_v1  ;;  %421 = vmatprep.subr.mxu1 %v30_v1  ;;  %v226_v10 = vld [vmem:[%s632_s2] sm:$0xff]  ;;  %v17_v11 = vld [vmem:[%s631_s0 + $0x18] sm:$0xff]  ;;  %v227_v16 = vld [vmem:[%s632_s2 + $0x8] sm:$0xff] }
   0x5   :  { %395 = vmatpush3.msra.mxu0 %v30_v1  ;;  %423 = vmatpush3.msra.mxu1 %v30_v1  ;;  %v25_v12 = vld [vmem:[%s631_s0 + $0x58] sm:$0xff]  ;;  %v18_v13 = vld [vmem:[%s631_s0 + $0x20] sm:$0xff]  ;;  %v19_v17 = vld [vmem:[%s631_s0 + $0x28] sm:$0xff] }
   0x6   :  { %396 = vmatprep.mubr.msk.f32.mxu0 %vm32_vm0, %v14_v3  ;;  %408 = vmatprep.mubr.msk.f32.mxu1 %vm32_vm0, %v22_v4  ;;  %v26_v14 = vld [vmem:[%s631_s0 + $0x60] sm:$0xff]  ;;  %v229_v15 = vld [vmem:[%s632_s2 + $0x18] sm:$0xff]  ;;  %v27_v18 = vld [vmem:[%s631_s0 + $0x68] sm:$0xff] }
   0x7   :  { %397 = vmatmul.mubr.msk.f32.vlgmr.msra.gmra.mxu0 %vm32_vm0, %v15_v5  ;;  %409 = vmatmul.mubr.msk.f32.vlgmr.msra.gmra.mxu1 %vm32_vm0, %v23_v6  ;;  %v20_v19 = vld [vmem:[%s631_s0 + $0x30] sm:$0xff]  ;;  %v231_v21 = vld [vmem:[%s632_s2 + $0x28] sm:$0xff]  ;;  %v230_v22 = vld [vmem:[%s632_s2 + $0x20] sm:$0xff] }
   0x8   :  { %399 = vmatprep.mubr.msk.f32.mxu0 %vm32_vm0, %v16_v7  ;;  %411 = vmatprep.mubr.msk.f32.mxu1 %vm32_vm0, %v24_v8  ;;  %v28_v20 = vld [vmem:[%s631_s0 + $0x70] sm:$0xff]  ;;  %v21_v23 = vld [vmem:[%s631_s0 + $0x38] sm:$0xff]  ;;  %v235_v27 = vld [vmem:[%s632_s2 + $0x48] sm:$0xff] }
   0x9   :  { %254 = vperm.xlu1 %426, %v228_v9   ;;  %244 = vperm.xlu0 %425, %v226_v10   ;;  %v29_v24 = vld [vmem:[%s631_s0 + $0x78] sm:$0xff]  ;;  %v232_v26 = vld [vmem:[%s632_s2 + $0x30] sm:$0xff]  ;;  %v234_v28 = vld [vmem:[%s632_s2 + $0x40] sm:$0xff] }
   0xa   :  { %v233_v25 = vld [vmem:[%s632_s2 + $0x38] sm:$0xff]  ;;  %v236_v30 = vld [vmem:[%s632_s2 + $0x50] sm:$0xff]  ;;  %v239_v31 = vld [vmem:[%s632_s2 + $0x68] sm:$0xff] }
   0xb   :  { %400 = vmatmul.mubr.msk.f32.gmra.mxu0 %vm32_vm0, %v17_v11  ;;  %412 = vmatmul.mubr.msk.f32.gmra.mxu1 %vm32_vm0, %v25_v12  ;;  %v237_v29 = vld [vmem:[%s632_s2 + $0x58] sm:$0xff]  ;;  %v238_v32 = vld [vmem:[%s632_s2 + $0x60] sm:$0xff]  ;;  %v240_v34 = vld [vmem:[%s632_s2 + $0x70] sm:$0xff] }
   0xc   :  { %402 = vmatprep.mubr.msk.f32.mxu0 %vm32_vm0, %v18_v13  ;;  %414 = vmatprep.mubr.msk.f32.mxu1 %vm32_vm0, %v26_v14  ;;  %v241_v33 = vld [vmem:[%s632_s2 + $0x78] sm:$0xff] }
   0xd   :  { %259 = vperm.xlu1 %426, %v229_v15   ;;  %249 = vperm.xlu0 %425, %v227_v16  }
   0xf   :  { %403 = vmatmul.mubr.msk.f32.gmra.mxu0 %vm32_vm0, %v19_v17  ;;  %415 = vmatmul.mubr.msk.f32.gmra.mxu1 %vm32_vm0, %v27_v18 }
  0x10   :  { %405 = vmatprep.mubr.msk.f32.mxu0 %vm32_vm0, %v20_v19  ;;  %417 = vmatprep.mubr.msk.f32.mxu1 %vm32_vm0, %v28_v20 }
  0x11   :  { %269 = vperm.xlu1 %426, %v231_v21   ;;  %264 = vperm.xlu0 %425, %v230_v22  }
  0x13   :  { %406 = vmatmul.mubr.msk.f32.gmra.mxu0 %vm32_vm0, %v21_v23  ;;  %418 = vmatmul.mubr.msk.f32.gmra.mxu1 %vm32_vm0, %v29_v24 }
  0x15   :  { %279 = vperm.xlu1 %426, %v233_v25   ;;  %274 = vperm.xlu0 %425, %v232_v26  }
  0x19   :  { %289 = vperm.xlu1 %426, %v235_v27   ;;  %284 = vperm.xlu0 %425, %v234_v28  }
  0x1d   :  { %299 = vperm.xlu1 %426, %v237_v29   ;;  %294 = vperm.xlu0 %425, %v236_v30  }
  0x21   :  { %309 = vperm.xlu1 %426, %v239_v31   ;;  %304 = vperm.xlu0 %425, %v238_v32  }
  0x25   :  { %319 = vperm.xlu1 %426, %v241_v33   ;;  %314 = vperm.xlu0 %425, %v240_v34  }
  0x84   :  { %v255_v35 = vpop.permute.xlu1 %254  ;;  %v245_v36 = vpop.permute.xlu0 %244 }
  0x88   :  { %v260_v37 = vpop.permute.xlu1 %259  ;;  %v250_v38 = vpop.permute.xlu0 %249 }
  0x8c   :  { %v270_v39 = vpop.permute.xlu1 %269  ;;  %v265_v40 = vpop.permute.xlu0 %264 }
  0x90   :  { %v280_v41 = vpop.permute.xlu1 %279  ;;  %v275_v42 = vpop.permute.xlu0 %274 }
  0x94   :  { %v290_v43 = vpop.permute.xlu1 %289  ;;  %v285_v44 = vpop.permute.xlu0 %284 }
  0x98   :  { %v300_v45 = vpop.permute.xlu1 %299  ;;  %v295_v48 = vpop.permute.xlu0 %294 }
  0x9c   :  { %v310_v57 = vpop.permute.xlu1 %309  ;;  %v305_v62 = vpop.permute.xlu0 %304 }
  0xa0   :  { %v320_v7 = vpop.permute.xlu1 %319  ;;  %v315_v12 = vpop.permute.xlu0 %314 }
  0xc7   :  { %v398_v46 = vpop.f32.mrf.mxu0  ;;  %v410_v47 = vpop.f32.mrf.mxu1 }
  0xc8   :  { %v323_v49 = vmul.f32 %v398_v46, %v250_v38  ;;  %v331_v50 = vmul.f32 %v410_v47, %v290_v43 }
  0xc9   :  { %v147_v51 = vpop.f32.mrf.mxu0  ;;  %v187_v52 = vpop.f32.mrf.mxu1 }
  0xca   :  { %339 = vst.msk [vmem:[%s633_s3 + $0x8] sm:$0xff] %vm32_vm0, %v323_v49  ;;  %347 = vst.msk [vmem:[%s633_s3 + $0x48] sm:$0xff] %vm32_vm0, %v331_v50  ;;  %v322_v53 = vmul.f32 %v245_v36, %v147_v51  ;;  %v330_v54 = vmul.f32 %v285_v44, %v187_v52 }
  0xcb   :  { %v401_v55 = vpop.f32.mrf.mxu0  ;;  %v413_v56 = vpop.f32.mrf.mxu1 }
  0xcc   :  { %338 = vst.msk [vmem:[%s633_s3] sm:$0xff] %vm32_vm0, %v322_v53  ;;  %346 = vst.msk [vmem:[%s633_s3 + $0x40] sm:$0xff] %vm32_vm0, %v330_v54  ;;  %v325_v58 = vmul.f32 %v401_v55, %v260_v37  ;;  %v333_v59 = vmul.f32 %v413_v56, %v300_v45 }
  0xcd   :  { %v157_v60 = vpop.f32.mrf.mxu0  ;;  %v197_v61 = vpop.f32.mrf.mxu1 }
  0xce   :  { %341 = vst.msk [vmem:[%s633_s3 + $0x18] sm:$0xff] %vm32_vm0, %v325_v58  ;;  %349 = vst.msk [vmem:[%s633_s3 + $0x58] sm:$0xff] %vm32_vm0, %v333_v59  ;;  %v324_v63 = vmul.f32 %v255_v35, %v157_v60  ;;  %v332_v0 = vmul.f32 %v295_v48, %v197_v61 }
  0xcf   :  { %v404_v1 = vpop.f32.mrf.mxu0  ;;  %v416_v2 = vpop.f32.mrf.mxu1 }
  0xd0   :  { %340 = vst.msk [vmem:[%s633_s3 + $0x10] sm:$0xff] %vm32_vm0, %v324_v63  ;;  %348 = vst.msk [vmem:[%s633_s3 + $0x50] sm:$0xff] %vm32_vm0, %v332_v0  ;;  %v327_v3 = vmul.f32 %v404_v1, %v270_v39  ;;  %v335_v4 = vmul.f32 %v416_v2, %v310_v57 }
  0xd1   :  { %v167_v5 = vpop.f32.mrf.mxu0  ;;  %v207_v6 = vpop.f32.mrf.mxu1 }
  0xd2   :  { %343 = vst.msk [vmem:[%s633_s3 + $0x28] sm:$0xff] %vm32_vm0, %v327_v3  ;;  %351 = vst.msk [vmem:[%s633_s3 + $0x68] sm:$0xff] %vm32_vm0, %v335_v4  ;;  %v326_v8 = vmul.f32 %v265_v40, %v167_v5  ;;  %v334_v9 = vmul.f32 %v305_v62, %v207_v6 }
  0xd3   :  { %v407_v10 = vpop.f32.mrf.mxu0  ;;  %v419_v11 = vpop.f32.mrf.mxu1 }
  0xd4   :  { %342 = vst.msk [vmem:[%s633_s3 + $0x20] sm:$0xff] %vm32_vm0, %v326_v8  ;;  %350 = vst.msk [vmem:[%s633_s3 + $0x60] sm:$0xff] %vm32_vm0, %v334_v9  ;;  %v329_v13 = vmul.f32 %v407_v10, %v280_v41  ;;  %v337_v14 = vmul.f32 %v419_v11, %v320_v7 }
  0xd5   :  { %v177_v15 = vpop.f32.mrf.mxu0  ;;  %v217_v16 = vpop.f32.mrf.mxu1 }
  0xd6   :  { %345 = vst.msk [vmem:[%s633_s3 + $0x38] sm:$0xff] %vm32_vm0, %v329_v13  ;;  %353 = vst.msk [vmem:[%s633_s3 + $0x78] sm:$0xff] %vm32_vm0, %v337_v14  ;;  %v328_v17 = vmul.f32 %v275_v42, %v177_v15  ;;  %v336_v18 = vmul.f32 %v315_v12, %v217_v16 }
  0xd8   :  { %344 = vst.msk [vmem:[%s633_s3 + $0x30] sm:$0xff] %vm32_vm0, %v328_v17  ;;  %352 = vst.msk [vmem:[%s633_s3 + $0x70] sm:$0xff] %vm32_vm0, %v336_v18 }

</bundles_post_ra>
